<compile_context>
chip_gen: v6e
topology: v6e:2x2x1
jax: 0.10.0
libtpu: 0.0.40
codegen_flags: <defaults>
</compile_context>

<pallas_src>
import jax
import jax.numpy as jnp
from jax.experimental import pallas as pl
from jax.experimental.pallas import tpu as pltpu


IN_CHANNELS = 256
OUT_DET = 1   # out_channels_detection
OUT_REG = 4   # out_channels_regression

_MAX_TILE_HW = 4096   # lanes per tile: 4 MiB fp32 x-tile; ~8.6 MiB total VMEM


def _choose_tile_hw(hw: int, n: int) -> int:
    """Pick the spatial tile: big for HBM-roofline, multiple-of-128 (or full
    extent), and small enough that the grid has >=2 steps when possible so
    v7x megacore can shard."""
    t = min(hw, _MAX_TILE_HW)
    if t < hw:
        t = max(128, (t // 128) * 128)        # (8,128) lane constraint
    total_steps = n * (-(-hw // t))
    if total_steps < 2 and hw > 128:
        half = -(-hw // 2)
        t = min(t, ((half + 127) // 128) * 128)
    return t


def _rpn_head_kernel(x_ref, w_ref, b_ref, out_ref):
    # x_ref: (1, C, T); w_ref: (P, C); b_ref: (P, 1); out_ref: (1, P, T)
    x = x_ref[0]                                              # (C, T)
    acc = jnp.dot(w_ref[...], x, preferred_element_type=jnp.float32)
    out_ref[0] = (acc + b_ref[...]).astype(out_ref.dtype)     # single 16xT store


def _rpn_head_conv(x3d, w_fused, b_fused):
    """x3d: (N, C, HW).  Returns fused head output (N, P, HW) float32,
    where rows [:A] are detection and rows [A:5A] are regression."""
    N, C, HW = x3d.shape
    P = w_fused.shape[0]
    t_hw = _choose_tile_hw(HW, N)
    grid = (N, pl.cdiv(HW, t_hw))

    x_itemsize = jnp.dtype(x3d.dtype).itemsize
    w_itemsize = jnp.dtype(w_fused.dtype).itemsize
    cost = pl.CostEstimate(
        flops=2 * N * HW * C * P,
        transcendentals=0,
        bytes_accessed=(N * C * HW * x_itemsize
                        + P * C * w_itemsize + P * 4
                        + N * P * HW * 4))

    out = pl.pallas_call(
        _rpn_head_kernel,
        out_shape=jax.ShapeDtypeStruct((N, P, HW), jnp.float32),
        grid_spec=pltpu.PrefetchScalarGridSpec(
            num_scalar_prefetch=0,
            grid=grid,
            in_specs=[
                pl.BlockSpec((1, C, t_hw), lambda n, t: (n, 0, t)),   # x tile
                pl.BlockSpec((P, C), lambda n, t: (0, 0)),            # fused W
                pl.BlockSpec((P, 1), lambda n, t: (0, 0)),            # fused b
            ],
            out_specs=pl.BlockSpec((1, P, t_hw), lambda n, t: (n, 0, t)),
        ),
        compiler_params=pltpu.CompilerParams(
            dimension_semantics=("parallel", "parallel"),
            vmem_limit_bytes=32 * 1024 * 1024),
        cost_estimate=cost,
    )(x3d, w_fused, b_fused)
    return out


class RPNHeadPallas:
    """JAX/Pallas reimplementation of RPNHead (two fused 1x1 convs)."""

    in_channels = IN_CHANNELS
    out_channels_detection = OUT_DET
    out_channels_regression = OUT_REG

    def __init__(self, number_of_object_proposals_per_anchor: int = 3, key=None):
        self.A = number_of_object_proposals_per_anchor
        if key is None:
            key = jax.random.PRNGKey(0)
        k1, k2, k3, k4 = jax.random.split(key, 4)
        c = IN_CHANNELS
        a = self.A
        # Deterministic synthetic conv parameters (1x1 conv == dense over C).
        # Stored as (out_channels, in_channels) so the kernel computes
        # (P, C) @ (C, HW_tile) directly on NCHW data.
        scale = 1.0 / jnp.sqrt(jnp.float32(c))
        self.w_det = jax.random.normal(k1, (OUT_DET * a, c), jnp.float32) * scale
        self.b_det = jax.random.normal(k2, (OUT_DET * a,), jnp.float32) * 0.01
        self.w_reg = jax.random.normal(k3, (OUT_REG * a, c), jnp.float32) * scale
        self.b_reg = jax.random.normal(k4, (OUT_REG * a,), jnp.float32) * 0.01

        # Fuse both heads into one weight/bias, padded to a sublane multiple
        # so each tile is a single aligned MXU op and a single aligned store.
        total = (OUT_DET + OUT_REG) * a           # 5A output channels
        pad = (-total) % 8
        self.P = total + pad
        self.w_fused = jnp.concatenate(
            [self.w_det, self.w_reg, jnp.zeros((pad, c), jnp.float32)], axis=0)
        self.b_fused = jnp.concatenate(
            [self.b_det, self.b_reg, jnp.zeros((pad,), jnp.float32)])[:, None]

    def __call__(self, x_nchw):
        N, C, H, W = x_nchw.shape
        assert C == IN_CHANNELS
        A = self.A
        hw = H * W

        # NCHW -> (N, C, H*W): a free reshape, no activation transpose in HBM.
        x3d = x_nchw.reshape(N, C, hw)
        w = self.w_fused
        if x3d.dtype == jnp.bfloat16:
            # bf16 activations from the producer: use bf16 weights, f32 acc.
            w = w.astype(jnp.bfloat16)
        out = _rpn_head_conv(x3d, w, self.b_fused)            # (N, P, hw) f32

        # Split the fused output.  Rows [:A] = detection (already in the
        # PyTorch (a, h, w) objectness order); rows [A:5A] = regression with
        # conv channel c = d*A + a, matching the PyTorch view (N, 4, A, H, W)
        # -> permute (0, 2, 3, 4, 1) -> view (N, A*H*W, 4).
        objectness = out[:, :A].reshape(N, A * hw)
        bbox = out[:, A:(OUT_DET + OUT_REG) * A].reshape(N, OUT_REG, A, hw)
        bbox = jnp.transpose(bbox, (0, 2, 3, 1)).reshape(N, A * hw, OUT_REG)
        return objectness, bbox


def _reference(x_nchw, head: RPNHeadPallas):
    """Pure-JAX mirror of the PyTorch forward (conv1x1 + formatting)."""
    N, C, H, W = x_nchw.shape
    A = head.A
    det = (jnp.einsum("nchw,oc->nohw", x_nchw, head.w_det)
           + head.b_det[None, :, None, None])
    reg = (jnp.einsum("nchw,oc->nohw", x_nchw, head.w_reg)
           + head.b_reg[None, :, None, None])
    obj = det.reshape(N, OUT_DET, A, H, W).transpose(0, 2, 3, 4, 1).reshape(N, -1)
    bbox = reg.reshape(N, OUT_REG, A, H, W).transpose(0, 2, 3, 4, 1)
    bbox = bbox.reshape(N, -1, OUT_REG)
    return obj, bbox


if __name__ == "__main__":
    key = jax.random.PRNGKey(0)
    kx, kp = jax.random.split(key)

    # in_channels is fixed at 256 by the module; small spatial extent.
    N, C, H, W = 2, IN_CHANNELS, 16, 16
    x = jax.random.normal(kx, (N, C, H, W), jnp.float32)

    head = RPNHeadPallas(number_of_object_proposals_per_anchor=3, key=kp)

    objectness, bbox = head(x)
    objectness = jax.block_until_ready(objectness)
    bbox = jax.block_until_ready(bbox)

    assert objectness.shape == (N, head.A * H * W)
    assert bbox.shape == (N, head.A * H * W, OUT_REG)

    obj_ref, bbox_ref = _reference(x, head)
    assert jnp.allclose(objectness, obj_ref, atol=1e-4, rtol=1e-4)
    assert jnp.allclose(bbox, bbox_ref, atol=1e-4, rtol=1e-4)

    print("KERNEL_OK")
</pallas_src>

<mosaic_0001>
module attributes {stable_mosaic.version = 11 : i64} {
  func.func @_rpn_head_kernel(%arg0: i32, %arg1: i32, %arg2: memref<1x256x256xf32, #tpu.memory_space<vmem>>, %arg3: memref<16x256xf32, #tpu.memory_space<vmem>>, %arg4: memref<16x1xf32, #tpu.memory_space<vmem>>, %arg5: memref<1x16x256xf32, #tpu.memory_space<vmem>>) attributes {dimension_semantics = [#tpu.dimension_semantics<parallel>, #tpu.dimension_semantics<parallel>], iteration_bounds = array<i64: 2, 1>, scalar_prefetch = 0 : i64, scratch_operands = 0 : i64, tpu.core_type = #tpu.core_type<tc>, window_params = [{transform_indices = @transform_0, window_bounds = array<i64: 1, 256, 256>}, {pipeline_mode = #tpu.pipeline_mode<synchronous>, transform_indices = @transform_1, window_bounds = array<i64: 16, 256>}, {pipeline_mode = #tpu.pipeline_mode<synchronous>, transform_indices = @transform_2, window_bounds = array<i64: 16, 1>}, {transform_indices = @transform_3, window_bounds = array<i64: 1, 16, 256>}]} {
    %c0 = arith.constant 0 : index
    %c0_0 = arith.constant 0 : index
    %c0_1 = arith.constant 0 : index
    %0 = vector.load %arg2[%c0, %c0_0, %c0_1] : memref<1x256x256xf32, #tpu.memory_space<vmem>>, vector<1x256x256xf32>
    %1 = vector.shape_cast %0 : vector<1x256x256xf32> to vector<256x256xf32>
    %c0_2 = arith.constant 0 : index
    %c0_3 = arith.constant 0 : index
    %2 = vector.load %arg3[%c0_2, %c0_3] : memref<16x256xf32, #tpu.memory_space<vmem>>, vector<16x256xf32>
    %cst = arith.constant dense<0.000000e+00> : vector<16x256xf32>
    %3 = tpu.matmul %2, %1, %cst {dimension_numbers = #tpu.dot_dimension_numbers<[1], [0], [0], [1], [0, 0, 1, 1], [], []>} : vector<16x256xf32>, vector<256x256xf32>, vector<16x256xf32> -> vector<16x256xf32>
    %c0_4 = arith.constant 0 : index
    %c0_5 = arith.constant 0 : index
    %4 = vector.load %arg4[%c0_4, %c0_5] : memref<16x1xf32, #tpu.memory_space<vmem>>, vector<16x1xf32>
    %5 = vector.broadcast %4 : vector<16x1xf32> to vector<16x256xf32>
    %6 = arith.addf %3, %5 : vector<16x256xf32>
    %c0_6 = arith.constant 0 : index
    %c0_7 = arith.constant 0 : index
    %c0_8 = arith.constant 0 : index
    %7 = vector.load %arg5[%c0_6, %c0_7, %c0_8] : memref<1x16x256xf32, #tpu.memory_space<vmem>>, vector<1x16x256xf32>
    %8 = vector.shape_cast %7 : vector<1x16x256xf32> to vector<16x256xf32>
    %9 = vector.shape_cast %6 : vector<16x256xf32> to vector<1x16x256xf32>
    tpu.vector_store %arg5[%c0_6, %c0_7, %c0_8], %9 {strides = array<i32>} : memref<1x16x256xf32, #tpu.memory_space<vmem>>, vector<1x16x256xf32>,
    return
  }
  func.func @transform_0(%arg0: i32, %arg1: i32) -> (i32, i32, i32) {
    %c0_i32 = arith.constant 0 : i32
    %c0_i32_0 = arith.constant 0 : i32
    return %arg0, %c0_i32, %arg1 : i32, i32, i32
  }
  func.func @transform_1(%arg0: i32, %arg1: i32) -> (i32, i32) {
    %c0_i32 = arith.constant 0 : i32
    %c0_i32_0 = arith.constant 0 : i32
    %c0_i32_1 = arith.constant 0 : i32
    return %c0_i32, %c0_i32_0 : i32, i32
  }
  func.func @transform_2(%arg0: i32, %arg1: i32) -> (i32, i32) {
    %c0_i32 = arith.constant 0 : i32
    %c0_i32_0 = arith.constant 0 : i32
    %c0_i32_1 = arith.constant 0 : i32
    return %c0_i32, %c0_i32_0 : i32, i32
  }
  func.func @transform_3(%arg0: i32, %arg1: i32) -> (i32, i32, i32) {
    %c0_i32 = arith.constant 0 : i32
    %c0_i32_0 = arith.constant 0 : i32
    return %arg0, %c0_i32, %arg1 : i32, i32, i32
  }
}

</mosaic_0001>

<bundles_post_ra>
// kernel: tpu_custom_call.1
= control target key start
LH: loop header
LB: loop body
LE: loop exit
PB: predicated region body
PF: predicated region fallthrough
CT: control target
= control target key end

     0   :  { %8 = vsyncpa [#allocation3], 0  ;;  %s1088_s0 = inlined_call_operand.hbm [shape: f32[2,256,256], index: 0, kind: input, shape index: {}]   ;;  %s1089_s1 = inlined_call_operand.hbm [shape: f32[16,256], index: 1, kind: input, shape index: {}]   ;;  %s1090_s2 = inlined_call_operand.vmem [shape: f32[16,1], index: 2, kind: input, shape index: {}]   ;;  %s1091_s3 = inlined_call_operand.hbm [shape: f32[2,16,256], index: 3, kind: output, shape index: {}]  }
   0x1   :  { %10 = vsyncpa [#allocation3 + $0x1], 0 }
   0x2   :  { %11 = vsyncpa [#allocation6], 0 }
   0x3   :  { %12 = vsyncpa [#allocation4], 0 }
   0x4   :  { %14 = vsyncpa [#allocation4 + $0x1], 0  ;;  %s828_s12 = smov 0   ;;  %s830_s13 = smov 0  }
   0x5   :  { %s832_s14 = smov 0   ;;  %s834_s15 = smov 0  }
   0x6   :  { %s836_s16 = smov 0   ;;  %s838_s17 = smov 0  }
   0x7 LB: > { %s498_s18 = sadd.s32 4294967295, %s798_s17   ;;  %s499_s19 = sadd.s32 4294967294, %s798_s17   ;;  %s798_s17 = sphi %s838_s17, %s20_s17   ;;  %s794_s16 = sphi %s836_s16, %s1113_s16   ;;  %s790_s15 = sphi %s834_s15, %s1112_s15   ;;  %s786_s14 = sphi %s832_s14, %s1111_s14   ;;  %s782_s13 = sphi %s830_s13, %s1110_s13   ;;  %s778_s12 = sphi %s828_s12, %s1109_s12  }
   0x8   : > { %p54_p0 = scmp.ne.s32.totalorder %s782_s13, %s778_s12  ;;  %p862_p1 = scmp.eq.s32.totalorder %s498_s18, 0 }
   0x9   : > { %p866_p2 = scmp.eq.s32.totalorder %s498_s18, 1  ;;  %p128_p3 = scmp.eq.s32.totalorder %s499_s19, 1 }
   0xa   : > { %p872_p4 = por %p862_p1, %p54_p0  ;;  %p500_p5 = scmp.ge.s32.totalorder %s798_s17, 1 }
   0xb   : > { %p877_p6 = por %p128_p3, %p54_p0  ;;  %p135_p7 = scmp.lt.s32.totalorder %s798_s17, 3 }
   0xc   : > { %s1097_s22 = scalar_select %p872_p4, 1, 0 }
   0xd   : > { %s1098_s23 = scalar_select %p877_p6, 1, 0 }
   0xe   : > { %p882_p8 = pnand %p500_p5, %p135_p7  ;;  %s800_s25 = smov [#allocation5]  }
   0xf   : > { %s147_s26 = sshll.u32 %s800_s25, 4  ;;  %s32_s28 = sadd.s32 1, %s794_s16  ;;  %s148_s26 = int_to_ptr.vmem [resolvable:$true] %s147_s26 }
  0x10   : > { %p589_p9 = pneg %p882_p8  ;;  %s671_s29 = scalar_lea.vmem %s148_s26, 512 }
  0x11   : > { %p672_p13 = scmp.ne.s32.totalorder %s148_s26, %s671_s29  ;;  %p679_p5 = scmp.lt.s32.totalorder %s148_s26, %s148_s26 }
  0x12   : > { %p891_p11 = pnand %p589_p9, %p862_p1  ;;  %p680_p7 = scmp.lt.s32.totalorder %s671_s29, %s671_s29 }
  0x14   : > { %p662_p12 = pneg %p891_p11  ;;  %p681_p6 = por %p680_p7, %p679_p5 }
  0x16   : > { %p674_p0 = pnand %p672_p13, %p662_p12 }
  0x18   : > { %p675_p3 = pneg %p674_p0 }
  0x1a   : > { %p682_p4 = pnand %p681_p6, %p675_p3 }
  0x1c   : > { %685 = shalt.err (!%p682_p4)
}
  0x1d   : > { %s1093_s30 = smov 256   ;;  %s1094_s4 = smov 16  }
  0x1e   : > { %592 = dma.hbm_to_vmem [thread:$0]  (!%p891_p11), %s1089_s1, 512, %s148_s26, [#allocation6], %s1093_s30, %s1093_s30, %s1094_s4  }
  0x1f   : > { %p34_p4 = scmp.ge.s32.totalorder %s32_s28, 2  ;;  %s41_s7 = sadd.s32 1, %s786_s14 }
  0x20   : > { %p48_p6 = scmp.ne.s32.totalorder %s786_s14, %s782_s13  ;;  %p49_p9 = scmp.eq.s32.totalorder %s798_s17, 0 }
  0x21   : > { %s1115_s28 = smov (%p34_p4, %s32_s28), 0  ;;  %p602_p0 = scmp.lt.s32.totalorder %s798_s17, 2 }
  0x22   : > { %p912_p12 = por %p49_p9, %p48_p6  ;;  %p918_p13 = por %p866_p2, %p48_p6 }
  0x23   : > { %s36_s10 = ssub.s32 %s794_s16, %s1115_s28  ;;  %s164_s11 = sand.u32 1, %s786_s14  }
  0x24   : > { %p39_p11 = scmp.eq.s32.totalorder %s36_s10, 0  ;;  %s503_s18 = sshll.u32 %s164_s11, 9 }
  0x25   : > { %s515_s25 = sshll.u32 %s794_s16, 13  ;;  %s168_s5 = scalar_lea.vmem [#allocation2], %s503_s18 }
  0x26   : > { %s927_s19 = scalar_select %p39_p11, %s786_s14, %s41_s7  }
  0x27   : > { %s176_s29 = scalar_lea.hbm %s1088_s0, %s515_s25  ;;  %s177_s6 = sshll.u32 %s168_s5, 4  ;;  %s178_s6 = int_to_ptr.vmem [resolvable:$true] %s177_s6 }
  0x28   : > { %p935_p2 = pnand %p602_p0, %p912_p12  ;;  %s165_s30 = scalar_lea.sflag [#allocation3], %s164_s11 }
  0x29   : > { %s699_s10 = scalar_lea.vmem %s178_s6, 8192  ;;  %s803_s7 = smov [#allocation2]  }
  0x2a   : > { %p688_p3 = pneg %p935_p2  ;;  %p700_p5 = scmp.ne.s32.totalorder %s178_s6, %s699_s10 }
  0x2b   : > { %s704_s4 = sshll.u32 %s803_s7, 4  ;;  %s705_s4 = int_to_ptr.vmem [resolvable:$false] %s704_s4 }
  0x2c   : > { %p702_p7 = pnand %p700_p5, %p688_p3  ;;  %s706_s25 = scalar_lea.vmem %s705_s4, 16384 }
  0x2d   : > { %p707_p6 = scmp.lt.s32.totalorder %s178_s6, %s705_s4  ;;  %p708_p9 = scmp.lt.s32.totalorder %s706_s25, %s699_s10 }
  0x2e   : > { %p703_p4 = pneg %p702_p7 }
  0x2f   : > { %p709_p11 = por %p708_p9, %p707_p6 }
  0x31   : > { %p710_p10 = pnand %p709_p11, %p703_p4 }
  0x33   : > { %713 = shalt.err (!%p710_p10)
}
  0x34   : > { %s1104_s8 = smov 16   ;;  %s1105_s18 = smov 256  }
  0x35   : > { %596 = dma.hbm_to_vmem [thread:$0]  (!%p935_p2), %s176_s29, 8192, %s178_s6, %s165_s30, %s1105_s18, %s1105_s18, %s1104_s8  }
  0x36   : > { %189 = sbr.rel (%p882_p8) target bundleno = 340 (0x154), region = 32  ;;  %s949_s11 = sand.u32 (!%p882_p8), 1, %s782_s13  }
  0x37   : > { %s507_s4 = sshll.u32 (!%p882_p8), %s949_s11, 9  ;;  %s192_s26 = scalar_lea.sflag (!%p882_p8), [#allocation3], %s949_s11 }
  0x38   : > { %s953_s27 = scalar_lea.vmem (!%p882_p8), [#allocation2], %s507_s4  ;;  %p1106_p10 = scmp.ne.s32.totalorder (!%p882_p8), %s1097_s22, 0 }
  0x3b   : > { %765 = dma.done.wait (%p1106_p10), %s192_s26, 8192  }
  0x3c   : > { %767 = vsyncadd (%p1106_p10), %s192_s26, 4294959104 }
  0x3d   : > { %769 = dma.done.wait (%p862_p1), [#allocation6], 512  }
  0x3e   : > { %771 = vsyncadd (%p862_p1), [#allocation6], 4294966784  ;;  %v804_v0 = vmov 0   ;;  %v255_v1 = vld [vmem:[%s953_s27 + $0xf8] sm:$0xff]  ;;  %v254_v2 = vld [vmem:[%s953_s27 + $0xf0] sm:$0xff]  ;;  %s509_s29 = sshll.u32 %s949_s11, 5 }
  0x3f   : > { %659 = vset.pattern.permute.xlu0 %v804_v0  ;;  %v253_v3 = vld [vmem:[%s953_s27 + $0xe8] sm:$0xff]  ;;  %304 = vmatprep.subr.mxu0 %v255_v1  ;;  %v252_v4 = vld [vmem:[%s953_s27 + $0xe0] sm:$0xff]  ;;  %v251_v5 = vld [vmem:[%s953_s27 + $0xd8] sm:$0xff]  ;;  %s221_s5 = scalar_lea.vmem [#allocation7], %s509_s29  ;;  %s516_s21 = sshll.u32 %s790_s15, 9 }
  0x40   : > { %517 = vmatprep.subr.mxu1 %v255_v1  ;;  %305 = vmatpush1.msra.mxu0 %v254_v2  ;;  %v250_v6 = vld [vmem:[%s953_s27 + $0xd0] sm:$0xff]  ;;  %v249_v7 = vld [vmem:[%s953_s27 + $0xc8] sm:$0xff]  ;;  %v248_v8 = vld [vmem:[%s953_s27 + $0xc0] sm:$0xff]  ;;  %s401_s6 = sshll.u32 %s221_s5, 4  ;;  %s1040_s25 = scalar_lea.hbm %s1091_s3, %s516_s21  ;;  %s1035_s6 = int_to_ptr.vmem [resolvable:$true] %s401_s6 }
  0x41   : > { %549 = vmatpush1.msra.mxu1 %v254_v2  ;;  %306 = vmatprep.subr.mxu0 %v253_v3  ;;  %v247_v9 = vld [vmem:[%s953_s27 + $0xb8] sm:$0xff]  ;;  %v246_v10 = vld [vmem:[%s953_s27 + $0xb0] sm:$0xff]  ;;  %v245_v11 = vld [vmem:[%s953_s27 + $0xa8] sm:$0xff]  ;;  %s386_s15 = scalar_lea.sflag [#allocation4], %s949_s11  ;;  %s714_s8 = scalar_lea.vmem %s1035_s6, 512 }
  0x42   : > { %518 = vmatprep.subr.mxu1 %v253_v3  ;;  %307 = vmatpush1.msra.mxu0 %v252_v4  ;;  %v244_v12 = vld [vmem:[%s953_s27 + $0xa0] sm:$0xff]  ;;  %v243_v13 = vld [vmem:[%s953_s27 + $0x98] sm:$0xff]  ;;  %v242_v14 = vld [vmem:[%s953_s27 + $0x90] sm:$0xff]  ;;  %p715_p1 = scmp.ne.s32.totalorder %s1035_s6, %s714_s8  ;;  %s805_s18 = smov [#allocation7]  }
  0x43   : > { %550 = vmatpush1.msra.mxu1 %v252_v4  ;;  %308 = vmatprep.subr.mxu0 %v251_v5  ;;  %v241_v15 = vld [vmem:[%s953_s27 + $0x88] sm:$0xff]  ;;  %v240_v16 = vld [vmem:[%s953_s27 + $0x80] sm:$0xff]  ;;  %v239_v17 = vld [vmem:[%s953_s27 + $0x78] sm:$0xff]  ;;  %s718_s4 = sshll.u32 %s805_s18, 4  ;;  %s719_s4 = int_to_ptr.vmem [resolvable:$false] %s718_s4 }
  0x44   : > { %519 = vmatprep.subr.mxu1 %v251_v5  ;;  %309 = vmatpush1.msra.mxu0 %v250_v6  ;;  %v238_v18 = vld [vmem:[%s953_s27 + $0x70] sm:$0xff]  ;;  %v237_v19 = vld [vmem:[%s953_s27 + $0x68] sm:$0xff]  ;;  %v236_v20 = vld [vmem:[%s953_s27 + $0x60] sm:$0xff]  ;;  %p716_p8 = pnand %p715_p1, %p918_p13  ;;  %s720_s26 = scalar_lea.vmem %s719_s4, 1024 }
  0x45   : > { %551 = vmatpush1.msra.mxu1 %v250_v6  ;;  %310 = vmatprep.subr.mxu0 %v249_v7  ;;  %v235_v21 = vld [vmem:[%s953_s27 + $0x58] sm:$0xff]  ;;  %v234_v22 = vld [vmem:[%s953_s27 + $0x50] sm:$0xff]  ;;  %v233_v23 = vld [vmem:[%s953_s27 + $0x48] sm:$0xff]  ;;  %p721_p0 = scmp.lt.s32.totalorder %s1035_s6, %s719_s4  ;;  %p722_p2 = scmp.lt.s32.totalorder %s720_s26, %s714_s8 }
  0x46   : > { %520 = vmatprep.subr.mxu1 %v249_v7  ;;  %311 = vmatpush1.msra.mxu0 %v248_v8  ;;  %v232_v24 = vld [vmem:[%s953_s27 + $0x40] sm:$0xff]  ;;  %v231_v25 = vld [vmem:[%s953_s27 + $0x38] sm:$0xff]  ;;  %v230_v26 = vld [vmem:[%s953_s27 + $0x30] sm:$0xff]  ;;  %p717_p12 = pneg %p716_p8 }
  0x47   : > { %552 = vmatpush1.msra.mxu1 %v248_v8  ;;  %312 = vmatprep.subr.mxu0 %v247_v9  ;;  %v229_v27 = vld [vmem:[%s953_s27 + $0x28] sm:$0xff]  ;;  %v228_v28 = vld [vmem:[%s953_s27 + $0x20] sm:$0xff]  ;;  %v227_v29 = vld [vmem:[%s953_s27 + $0x18] sm:$0xff]  ;;  %p723_p3 = por %p722_p2, %p721_p0 }
  0x48   : > { %521 = vmatprep.subr.mxu1 %v247_v9  ;;  %313 = vmatpush1.msra.mxu0 %v246_v10  ;;  %v226_v30 = vld [vmem:[%s953_s27 + $0x10] sm:$0xff]  ;;  %v225_v31 = vld [vmem:[%s953_s27 + $0x8] sm:$0xff]  ;;  %v224_v32 = vld [vmem:[%s953_s27] sm:$0xff] }
  0x49   : > { %553 = vmatpush1.msra.mxu1 %v246_v10  ;;  %314 = vmatprep.subr.mxu0 %v245_v11  ;;  %v287_v33 = vld [vmem:[%s953_s27 + $0x1f8] sm:$0xff]  ;;  %v286_v34 = vld [vmem:[%s953_s27 + $0x1f0] sm:$0xff]  ;;  %v285_v35 = vld [vmem:[%s953_s27 + $0x1e8] sm:$0xff]  ;;  %p724_p5 = pnand %p723_p3, %p717_p12 }
  0x4a   : > { %522 = vmatprep.subr.mxu1 %v245_v11  ;;  %315 = vmatpush1.msra.mxu0 %v244_v12  ;;  %v284_v36 = vld [vmem:[%s953_s27 + $0x1e0] sm:$0xff]  ;;  %v283_v37 = vld [vmem:[%s953_s27 + $0x1d8] sm:$0xff]  ;;  %v282_v38 = vld [vmem:[%s953_s27 + $0x1d0] sm:$0xff] }
  0x4b   : > { %554 = vmatpush1.msra.mxu1 %v244_v12  ;;  %316 = vmatprep.subr.mxu0 %v243_v13  ;;  %v281_v39 = vld [vmem:[%s953_s27 + $0x1c8] sm:$0xff]  ;;  %v280_v40 = vld [vmem:[%s953_s27 + $0x1c0] sm:$0xff]  ;;  %v279_v41 = vld [vmem:[%s953_s27 + $0x1b8] sm:$0xff] }
  0x4c   : > { %523 = vmatprep.subr.mxu1 %v243_v13  ;;  %317 = vmatpush1.msra.mxu0 %v242_v14  ;;  %v278_v42 = vld [vmem:[%s953_s27 + $0x1b0] sm:$0xff]  ;;  %v277_v43 = vld [vmem:[%s953_s27 + $0x1a8] sm:$0xff]  ;;  %v276_v44 = vld [vmem:[%s953_s27 + $0x1a0] sm:$0xff] }
  0x4d   : > { %555 = vmatpush1.msra.mxu1 %v242_v14  ;;  %318 = vmatprep.subr.mxu0 %v241_v15  ;;  %v275_v45 = vld [vmem:[%s953_s27 + $0x198] sm:$0xff]  ;;  %v274_v46 = vld [vmem:[%s953_s27 + $0x190] sm:$0xff]  ;;  %v273_v47 = vld [vmem:[%s953_s27 + $0x188] sm:$0xff] }
  0x4e   : > { %524 = vmatprep.subr.mxu1 %v241_v15  ;;  %319 = vmatpush1.msra.mxu0 %v240_v16  ;;  %v272_v48 = vld [vmem:[%s953_s27 + $0x180] sm:$0xff]  ;;  %v271_v49 = vld [vmem:[%s953_s27 + $0x178] sm:$0xff]  ;;  %v270_v50 = vld [vmem:[%s953_s27 + $0x170] sm:$0xff] }
  0x4f   : > { %556 = vmatpush1.msra.mxu1 %v240_v16  ;;  %320 = vmatprep.subr.mxu0 %v239_v17  ;;  %v269_v51 = vld [vmem:[%s953_s27 + $0x168] sm:$0xff]  ;;  %v268_v52 = vld [vmem:[%s953_s27 + $0x160] sm:$0xff]  ;;  %v267_v53 = vld [vmem:[%s953_s27 + $0x158] sm:$0xff] }
  0x50   : > { %525 = vmatprep.subr.mxu1 %v239_v17  ;;  %321 = vmatpush1.msra.mxu0 %v238_v18  ;;  %v266_v54 = vld [vmem:[%s953_s27 + $0x150] sm:$0xff]  ;;  %v265_v55 = vld [vmem:[%s953_s27 + $0x148] sm:$0xff]  ;;  %v264_v56 = vld [vmem:[%s953_s27 + $0x140] sm:$0xff] }
  0x51   : > { %557 = vmatpush1.msra.mxu1 %v238_v18  ;;  %322 = vmatprep.subr.mxu0 %v237_v19  ;;  %v263_v57 = vld [vmem:[%s953_s27 + $0x138] sm:$0xff]  ;;  %v262_v58 = vld [vmem:[%s953_s27 + $0x130] sm:$0xff]  ;;  %v261_v59 = vld [vmem:[%s953_s27 + $0x128] sm:$0xff] }
  0x52   : > { %526 = vmatprep.subr.mxu1 %v237_v19  ;;  %323 = vmatpush1.msra.mxu0 %v236_v20  ;;  %v260_v60 = vld [vmem:[%s953_s27 + $0x120] sm:$0xff]  ;;  %v259_v61 = vld [vmem:[%s953_s27 + $0x118] sm:$0xff]  ;;  %v258_v62 = vld [vmem:[%s953_s27 + $0x110] sm:$0xff] }
  0x53   : > { %558 = vmatpush1.msra.mxu1 %v236_v20  ;;  %324 = vmatprep.subr.mxu0 %v235_v21  ;;  %v257_v63 = vld [vmem:[%s953_s27 + $0x108] sm:$0xff]  ;;  %v256_v0 = vld [vmem:[%s953_s27 + $0x100] sm:$0xff]  ;;  %v291_v2 = vld [vmem:[#allocation5 + $0x18] sm:$0xff] }
  0x54   : > { %527 = vmatprep.subr.mxu1 %v235_v21  ;;  %325 = vmatpush1.msra.mxu0 %v234_v22  ;;  %v289_v1 = vld [vmem:[#allocation5 + $0x8] sm:$0xff]  ;;  %v288_v3 = vld [vmem:[#allocation5] sm:$0xff]  ;;  %v290_v4 = vld [vmem:[#allocation5 + $0x10] sm:$0xff] }
  0x55   : > { %559 = vmatpush1.msra.mxu1 %v234_v22  ;;  %326 = vmatprep.subr.mxu0 %v233_v23  ;;  %v292_v5 = vld [vmem:[%s1090_s2] sm:$0xff]  ;;  %v293_v6 = vld [vmem:[%s1090_s2 + $0x8] sm:$0xff] }
  0x56   : > { %528 = vmatprep.subr.mxu1 %v233_v23  ;;  %327 = vmatpush1.msra.mxu0 %v232_v24 }
  0x57   : > { %560 = vmatpush1.msra.mxu1 %v232_v24  ;;  %328 = vmatprep.subr.mxu0 %v231_v25 }
  0x58   : > { %529 = vmatprep.subr.mxu1 %v231_v25  ;;  %329 = vmatpush1.msra.mxu0 %v230_v26 }
  0x59   : > { %561 = vmatpush1.msra.mxu1 %v230_v26  ;;  %330 = vmatprep.subr.mxu0 %v229_v27 }
  0x5a   : > { %530 = vmatprep.subr.mxu1 %v229_v27  ;;  %331 = vmatpush1.msra.mxu0 %v228_v28 }
  0x5b   : > { %562 = vmatpush1.msra.mxu1 %v228_v28  ;;  %332 = vmatprep.subr.mxu0 %v227_v29 }
  0x5c   : > { %531 = vmatprep.subr.mxu1 %v227_v29  ;;  %333 = vmatpush1.msra.mxu0 %v226_v30 }
  0x5d   : > { %563 = vmatpush1.msra.mxu1 %v226_v30  ;;  %334 = vmatprep.subr.mxu0 %v225_v31 }
  0x5e   : > { %532 = vmatprep.subr.mxu1 %v225_v31  ;;  %335 = vmatpush1.msra.mxu0 %v224_v32 }
  0x5f   : > { %564 = vmatpush1.msra.mxu1 %v224_v32  ;;  %336 = vmatprep.subr.mxu0 %v287_v33 }
  0x60   : > { %533 = vmatprep.subr.mxu1 %v287_v33  ;;  %337 = vmatpush2.msra.mxu0 %v286_v34 }
  0x61   : > { %565 = vmatpush2.msra.mxu1 %v286_v34  ;;  %338 = vmatprep.subr.mxu0 %v285_v35 }
  0x62   : > { %534 = vmatprep.subr.mxu1 %v285_v35  ;;  %339 = vmatpush2.msra.mxu0 %v284_v36 }
  0x63   : > { %566 = vmatpush2.msra.mxu1 %v284_v36  ;;  %340 = vmatprep.subr.mxu0 %v283_v37 }
  0x64   : > { %535 = vmatprep.subr.mxu1 %v283_v37  ;;  %341 = vmatpush2.msra.mxu0 %v282_v38 }
  0x65   : > { %567 = vmatpush2.msra.mxu1 %v282_v38  ;;  %342 = vmatprep.subr.mxu0 %v281_v39 }
  0x66   : > { %536 = vmatprep.subr.mxu1 %v281_v39  ;;  %343 = vmatpush2.msra.mxu0 %v280_v40 }
  0x67   : > { %568 = vmatpush2.msra.mxu1 %v280_v40  ;;  %344 = vmatprep.subr.mxu0 %v279_v41 }
  0x68   : > { %537 = vmatprep.subr.mxu1 %v279_v41  ;;  %345 = vmatpush2.msra.mxu0 %v278_v42 }
  0x69   : > { %569 = vmatpush2.msra.mxu1 %v278_v42  ;;  %346 = vmatprep.subr.mxu0 %v277_v43 }
  0x6a   : > { %538 = vmatprep.subr.mxu1 %v277_v43  ;;  %347 = vmatpush2.msra.mxu0 %v276_v44 }
  0x6b   : > { %570 = vmatpush2.msra.mxu1 %v276_v44  ;;  %348 = vmatprep.subr.mxu0 %v275_v45 }
  0x6c   : > { %539 = vmatprep.subr.mxu1 %v275_v45  ;;  %349 = vmatpush2.msra.mxu0 %v274_v46 }
  0x6d   : > { %571 = vmatpush2.msra.mxu1 %v274_v46  ;;  %350 = vmatprep.subr.mxu0 %v273_v47 }
  0x6e   : > { %540 = vmatprep.subr.mxu1 %v273_v47  ;;  %351 = vmatpush2.msra.mxu0 %v272_v48 }
  0x6f   : > { %572 = vmatpush2.msra.mxu1 %v272_v48  ;;  %352 = vmatprep.subr.mxu0 %v271_v49 }
  0x70   : > { %541 = vmatprep.subr.mxu1 %v271_v49  ;;  %353 = vmatpush2.msra.mxu0 %v270_v50 }
  0x71   : > { %573 = vmatpush2.msra.mxu1 %v270_v50  ;;  %354 = vmatprep.subr.mxu0 %v269_v51 }
  0x72   : > { %542 = vmatprep.subr.mxu1 %v269_v51  ;;  %355 = vmatpush2.msra.mxu0 %v268_v52 }
  0x73   : > { %574 = vmatpush2.msra.mxu1 %v268_v52  ;;  %356 = vmatprep.subr.mxu0 %v267_v53 }
  0x74   : > { %543 = vmatprep.subr.mxu1 %v267_v53  ;;  %357 = vmatpush2.msra.mxu0 %v266_v54 }
  0x75   : > { %575 = vmatpush2.msra.mxu1 %v266_v54  ;;  %358 = vmatprep.subr.mxu0 %v265_v55 }
  0x76   : > { %544 = vmatprep.subr.mxu1 %v265_v55  ;;  %359 = vmatpush2.msra.mxu0 %v264_v56 }
  0x77   : > { %576 = vmatpush2.msra.mxu1 %v264_v56  ;;  %360 = vmatprep.subr.mxu0 %v263_v57 }
  0x78   : > { %545 = vmatprep.subr.mxu1 %v263_v57  ;;  %361 = vmatpush2.msra.mxu0 %v262_v58 }
  0x79   : > { %577 = vmatpush2.msra.mxu1 %v262_v58  ;;  %362 = vmatprep.subr.mxu0 %v261_v59 }
  0x7a   : > { %546 = vmatprep.subr.mxu1 %v261_v59  ;;  %363 = vmatpush2.msra.mxu0 %v260_v60 }
  0x7b   : > { %578 = vmatpush2.msra.mxu1 %v260_v60  ;;  %364 = vmatprep.subr.mxu0 %v259_v61 }
  0x7c   : > { %547 = vmatprep.subr.mxu1 %v259_v61  ;;  %365 = vmatpush2.msra.mxu0 %v258_v62 }
  0x7d   : > { %579 = vmatpush2.msra.mxu1 %v258_v62  ;;  %366 = vmatprep.subr.mxu0 %v257_v63 }
  0x7e   : > { %548 = vmatprep.subr.mxu1 %v257_v63  ;;  %367 = vmatpush2.msra.mxu0 %v256_v0 }
  0x7f   : > { %580 = vmatpush2.msra.mxu1 %v256_v0  ;;  %368 = vmatprep.mubr.f32.mxu0 %v289_v1 }
  0x80   : > { %374 = vmatprep.mubr.f32.mxu1 %v291_v2  ;;  %369 = vmatmul.mubr.f32.vlgmr.msra.gmra.mxu0 %v288_v3 }
  0x81   : > { %375 = vmatmul.mubr.f32.vlgmr.msra.gmra.mxu1 %v290_v4  ;;  %296 = vperm.xlu0 %659, %v292_v5  }
  0x85   : > { %301 = vperm.xlu0 %659, %v293_v6  }
  0xfc   : > { %v297_v7 = vpop.permute.xlu0 %296 }
 0x100   : > { %v302_v8 = vpop.permute.xlu0 %301 }
 0x140   : > { %v370_v9 = vpop.f32.mrf.mxu0 }
 0x141   : > { %v376_v10 = vpop.f32.mrf.mxu1  ;;  %v371_v11 = vadd.f32 %v370_v9, %v297_v7 }
 0x142   : > { %v377_v12 = vadd.f32 %v376_v10, %v302_v8  ;;  %v372_v13 = vpop.f32.mrf.mxu0 }
 0x143   : > { %v378_v14 = vpop.f32.mrf.mxu1  ;;  %381 = vst [vmem:[%s221_s5] sm:$0xff] %v371_v11  ;;  %v373_v15 = vadd.f32 %v372_v13, %v297_v7 }
 0x144   : > { %383 = vst [vmem:[%s221_s5 + $0x10] sm:$0xff] %v377_v12  ;;  %v379_v16 = vadd.f32 %v378_v14, %v302_v8 }
 0x145   : > { %382 = vst [vmem:[%s221_s5 + $0x8] sm:$0xff] %v373_v15 }
 0x146   : > { %384 = vst [vmem:[%s221_s5 + $0x18] sm:$0xff] %v379_v16 }
 0x147   : > { %727 = shalt.err (!%p724_p5)
}
 0x148   : > { %s728_s27 = scalar_lea.hbm %s1040_s25, 512  ;;  %s732_s24 = scalar_lea.hbm %s1091_s3, 1024 }
 0x149   : > { %p729_p7 = scmp.ne.s32.totalorder %s1040_s25, %s728_s27  ;;  %p733_p9 = scmp.lt.s32.totalorder %s1040_s25, %s1091_s3 }
 0x14a   : > { %p734_p11 = scmp.lt.s32.totalorder %s732_s24, %s728_s27 }
 0x14b   : > { %p730_p4 = pnand %p729_p7, %p918_p13 }
 0x14c   : > { %p735_p10 = por %p734_p11, %p733_p9 }
 0x14d   : > { %p731_p6 = pneg %p730_p4 }
 0x14f   : > { %p736_p1 = pnand %p735_p10, %p731_p6 }
 0x151   : > { %739 = shalt.err (!%p736_p1)
}
 0x152   : > { %s806_s5 = smov 256   ;;  %s807_s21 = smov 16  }
 0x153   : > { %587 = dma.vmem_to_hbm [thread:$0]  (%p918_p13), %s1035_s6, 512, %s1040_s25, %s386_s15, %s806_s5, %s806_s5, %s807_s21  }
 0x154 PF: > { %s416_s10 = sand.u32 1, %s778_s12   ;;  %p1107_p8 = scmp.ne.s32.totalorder %s1098_s23, 0 }
 0x155   : > { %p1108_p12 = scmp.ge.s32.totalorder %s798_s17, 2  ;;  %s417_s7 = scalar_lea.sflag [#allocation4], %s416_s10 }
 0x157   : > { %p598_p0 = pnand %p1108_p12, %p1107_p8 }
 0x159   : > { %p599_p2 = pneg %p598_p0 }
 0x15b   : > { %773 = dma.done.wait (%p599_p2), %s417_s7, 512  }
 0x15c   : > { %775 = vsyncadd (%p599_p2), %s417_s7, 4294966784  ;;  %s20_s17 = sadd.s32 1, %s798_s17   ;;  %s1109_s12 = smov %s782_s13 }
 0x15d   : > { %p17_p3 = scmp.ge.s32.totalorder %s20_s17, 4   ;;  %s1110_s13 = smov %s786_s14 }
 0x15e   : > { %s1111_s14 = smov %s927_s19  ;;  %s1112_s15 = smov %s794_s16 }
 0x15f   : > { %s1113_s16 = smov %s1115_s28  ;;  %19 = sbr.rel (!%p17_p3) target bundleno = 7 (0x7), region = 81 }
 0x164   :  { %422 = vsyncpa [#allocation3], 1 }
 0x165   :  { %424 = vsyncpa [#allocation3 + $0x1], 1 }
 0x166   :  { %425 = vsyncpa [#allocation6], 1 }
 0x167   :  { %426 = vsyncpa [#allocation4], 1 }
 0x168   :  { %428 = vsyncpa [#allocation4 + $0x1], 1 }

</bundles_post_ra>
